<compile_context>
chip_gen: v7x
topology: tpu7x:2x2x1
jax: 0.10.0
libtpu: 0.0.40
codegen_flags: <defaults>
</compile_context>

<pallas_src>
import functools
import math

import jax
import jax.numpy as jnp
from jax import random
from jax.experimental import pallas as pl
from jax.experimental.pallas import tpu as pltpu


# ----------------------------------------------------------------------------
# Tiling helpers
# ----------------------------------------------------------------------------
def _pick_tile(dim, candidates):
    """Largest candidate that exactly divides `dim`, else the full dim."""
    for t in candidates:
        if dim % t == 0:
            return t
    return dim


_MM_COMPILER_PARAMS = pltpu.CompilerParams(
    dimension_semantics=("parallel", "parallel", "arbitrary"),
    vmem_limit_bytes=32 * 1024 * 1024,
)


# ----------------------------------------------------------------------------
# Pallas kernels
# ----------------------------------------------------------------------------
def _mm_kernel(a_ref, w_ref, b_ref, *rest, relu, has_res):
    """Tiled  out = act(A @ W + bias [+ residual])  with f32 K-accumulation."""
    if has_res:
        r_ref, o_ref, acc_ref = rest
    else:
        o_ref, acc_ref = rest
    k = pl.program_id(2)

    @pl.when(k == 0)
    def _init():
        acc_ref[...] = jnp.zeros_like(acc_ref)

    acc_ref[...] += jnp.dot(a_ref[...], w_ref[...],
                            preferred_element_type=jnp.float32)

    @pl.when(k == pl.num_programs(2) - 1)
    def _epilogue():
        acc = acc_ref[...] + b_ref[...].astype(jnp.float32)
        if has_res:
            acc = acc + r_ref[...].astype(jnp.float32)
        if relu:
            acc = jnp.maximum(acc, 0.0)
        o_ref[...] = acc.astype(o_ref.dtype)


def _maxpool_kernel(x_ref, o_ref):
    """x: (tm, KK, C) -> elementwise max over the KK tap axis (VPU)."""
    m = x_ref[:, 0, :]
    for t in range(1, x_ref.shape[1]):
        m = jnp.maximum(m, x_ref[:, t, :])
    o_ref[...] = m


def _gap_kernel(x_ref, o_ref, *, inv):
    """x: (N, HW, C) -> per-image spatial mean in f32."""
    for n in range(x_ref.shape[0]):
        o_ref[pl.ds(n, 1), :] = (
            jnp.sum(x_ref[n].astype(jnp.float32), axis=0, keepdims=True) * inv
        )


# ----------------------------------------------------------------------------
# Pallas wrappers
# ----------------------------------------------------------------------------
def matmul_bias(a, w, bias, *, relu, residual=None, out_dtype=jnp.bfloat16):
    """a:(M,K), w:(K,N) bf16 (BN scale folded), bias:(1,N) f32 -> (M,N)."""
    M, K = a.shape
    Kw, N = w.shape
    assert K == Kw and bias.shape == (1, N)

    tm = _pick_tile(M, (256, 128, 64, 32, 16, 8))
    tn = _pick_tile(N, (256, 128))
    tk = _pick_tile(K, (512, 384, 256, 128))
    grid = (M // tm, N // tn, K // tk)

    ins = [a.astype(jnp.bfloat16), w, bias]
    in_specs = [
        pl.BlockSpec((tm, tk), lambda i, j, k: (i, k)),
        pl.BlockSpec((tk, tn), lambda i, j, k: (k, j)),
        pl.BlockSpec((1, tn), lambda i, j, k: (0, j)),
    ]
    if residual is not None:
        ins.append(residual.astype(jnp.bfloat16))
        # Same index map as the output: stays resident in VMEM across K steps.
        in_specs.append(pl.BlockSpec((tm, tn), lambda i, j, k: (i, j)))

    kernel = functools.partial(_mm_kernel, relu=relu,
                               has_res=residual is not None)
    return pl.pallas_call(
        kernel,
        out_shape=jax.ShapeDtypeStruct((M, N), out_dtype),
        grid_spec=pltpu.PrefetchScalarGridSpec(
            num_scalar_prefetch=0,
            grid=grid,
            in_specs=in_specs,
            out_specs=pl.BlockSpec((tm, tn), lambda i, j, k: (i, j)),
            scratch_shapes=[pltpu.VMEM((tm, tn), jnp.float32)],
        ),
        compiler_params=_MM_COMPILER_PARAMS,
    )(*ins)


def _extract_patches(x, kh, kw, stride, pad, pad_value=0.0):
    """x: NHWC -> (N, Ho, Wo, kh*kw, C) im2col patches (plain-JAX glue)."""
    N, H, W, C = x.shape
    x_p = jnp.pad(x, ((0, 0), (pad, pad), (pad, pad), (0, 0)),
                  constant_values=pad_value)
    Ho = (H + 2 * pad - kh) // stride + 1
    Wo = (W + 2 * pad - kw) // stride + 1
    taps = []
    for i in range(kh):
        for j in range(kw):
            taps.append(x_p[:, i:i + Ho * stride:stride,
                            j:j + Wo * stride:stride, :])
    return jnp.stack(taps, axis=3)  # (N, Ho, Wo, kh*kw, C)


def conv_bn(x, p, *, stride, pad, relu, residual=None):
    """Conv2d (no bias) + folded BatchNorm (+ residual) (+ ReLU).  x: NHWC."""
    kh, kw, cout = p["kh"], p["kw"], p["cout"]
    N, H, W, Cin = x.shape
    if kh == 1 and kw == 1 and pad == 0:
        # 1x1 conv: no im2col at all, just a (strided) view + reshape.
        xs = x[:, ::stride, ::stride, :] if stride > 1 else x
        Ho, Wo = xs.shape[1], xs.shape[2]
        A = xs.reshape(N * Ho * Wo, Cin)
    else:
        # TODO(synk): 3x3/7x7 convs still materialize an im2col patch tensor in
        # HBM; a direct tap-accumulating Pallas conv would cut that traffic ~9x.
        patches = _extract_patches(x, kh, kw, stride, pad)
        Ho, Wo = patches.shape[1], patches.shape[2]
        A = patches.reshape(N * Ho * Wo, kh * kw * Cin)
    res = None if residual is None else residual.reshape(N * Ho * Wo, cout)
    out = matmul_bias(A, p["w"], p["b"], relu=relu, residual=res,
                      out_dtype=jnp.bfloat16)
    return out.reshape(N, Ho, Wo, cout)


def maxpool2d(x, k=3, stride=2, pad=1):
    """PyTorch MaxPool2d(3, stride=2, padding=1) semantics.  x: NHWC."""
    patches = _extract_patches(x, k, k, stride, pad, pad_value=-jnp.inf)
    N, Ho, Wo, KK, C = patches.shape
    M = N * Ho * Wo
    A = patches.reshape(M, KK, C)
    tm = _pick_tile(M, (512, 256, 128, 64, 32, 16, 8))
    out = pl.pallas_call(
        _maxpool_kernel,
        out_shape=jax.ShapeDtypeStruct((M, C), x.dtype),
        grid=(M // tm,),
        in_specs=[pl.BlockSpec((tm, KK, C), lambda i: (i, 0, 0))],
        out_specs=pl.BlockSpec((tm, C), lambda i: (i, 0)),
        compiler_params=pltpu.CompilerParams(
            dimension_semantics=("parallel",)),
    )(A)
    return out.reshape(N, Ho, Wo, C)


def global_avgpool(x):
    """AdaptiveAvgPool2d(1) over NHWC -> (N, C) f32."""
    N, H, W, C = x.shape
    A = x.reshape(N, H * W, C)
    kernel = functools.partial(_gap_kernel, inv=1.0 / float(H * W))
    return pl.pallas_call(
        kernel,
        out_shape=jax.ShapeDtypeStruct((N, C), jnp.float32),
        grid=(1,),
        in_specs=[pl.BlockSpec((N, H * W, C), lambda i: (0, 0, 0))],
        out_specs=pl.BlockSpec((N, C), lambda i: (0, 0)),
    )(A)


# ----------------------------------------------------------------------------
# Deterministic synthetic parameters (eval-mode BN folded; weights pre-packed)
# ----------------------------------------------------------------------------
def conv_bn_params(key, cin, cout, k):
    k1, k2, k3, k4, k5 = random.split(key, 5)
    fan_in = cin * k * k
    w = random.normal(k1, (cout, cin, k, k), jnp.float32) / math.sqrt(fan_in)
    gamma = random.uniform(k2, (cout,), jnp.float32, 0.5, 1.5)
    beta = random.normal(k3, (cout,), jnp.float32) * 0.1
    mean = random.normal(k4, (cout,), jnp.float32) * 0.1
    var = random.uniform(k5, (cout,), jnp.float32, 0.5, 1.5)
    scale = gamma / jnp.sqrt(var + 1e-5)
    bias = beta - mean * scale
    # Pre-transpose to (kh*kw*cin, cout), fold the BN scale into the columns
    # and cast to bf16 once (hoisted out of the forward pass).  Row ordering
    # (tap i*kw+j, channel c) matches the im2col patch layout.
    wmat = jnp.transpose(w, (2, 3, 1, 0)).reshape(k * k * cin, cout)
    wmat = (wmat * scale[None, :]).astype(jnp.bfloat16)
    return {"w": wmat, "b": bias.reshape(1, cout).astype(jnp.float32),
            "kh": k, "kw": k, "cout": cout}


def make_resnet50_params(key):
    # TODO(synk): `pretrained=True` would load torchvision weights from a
    # checkpoint; here parameters are deterministic synthetic initializations.
    keys = iter(random.split(key, 256))
    params = {"conv1": conv_bn_params(next(keys), 3, 64, 7)}
    layers = []
    in_ch = 64
    for planes, blocks, stride in [(64, 3, 1), (128, 4, 2), (256, 6, 2),
                                   (512, 3, 2)]:
        blist = []
        for b in range(blocks):
            bp = {
                "stride": stride if b == 0 else 1,
                "conv1": conv_bn_params(next(keys), in_ch, planes, 1),
                "conv2": conv_bn_params(next(keys), planes, planes, 3),
                "conv3": conv_bn_params(next(keys), planes, planes * 4, 1),
            }
            if b == 0:  # torchvision adds downsample on first block of a layer
                bp["downsample"] = conv_bn_params(next(keys), in_ch,
                                                  planes * 4, 1)
            in_ch = planes * 4
            blist.append(bp)
        layers.append(blist)
    params["layers"] = layers
    k1, k2 = random.split(next(keys))
    fc_w = random.normal(k1, (1000, 2048), jnp.float32) / math.sqrt(2048)
    fc_b = random.normal(k2, (1000,), jnp.float32) * 0.1
    params["fc"] = {"w": jnp.transpose(fc_w).astype(jnp.bfloat16),  # (2048,1000)
                    "b": fc_b.reshape(1, 1000).astype(jnp.float32)}
    return params


# ----------------------------------------------------------------------------
# Forward pass (torchvision ResNet-50 / Bottleneck-v1.5 semantics)
# ----------------------------------------------------------------------------
def bottleneck(x, bp):
    s = bp["stride"]
    out = conv_bn(x, bp["conv1"], stride=1, pad=0, relu=True)
    out = conv_bn(out, bp["conv2"], stride=s, pad=1, relu=True)
    if "downsample" in bp:
        identity = conv_bn(x, bp["downsample"], stride=s, pad=0, relu=False)
    else:
        identity = x
    # bn3(conv3(out)) + identity, then ReLU -- fused into the matmul epilogue.
    return conv_bn(out, bp["conv3"], stride=1, pad=0, relu=True,
                   residual=identity)


def resnet50_forward(x_nchw, params):
    x = jnp.transpose(x_nchw, (0, 2, 3, 1)).astype(jnp.bfloat16)  # NCHW->NHWC
    x = conv_bn(x, params["conv1"], stride=2, pad=3, relu=True)
    x = maxpool2d(x, k=3, stride=2, pad=1)
    for blist in params["layers"]:
        for bp in blist:
            x = bottleneck(x, bp)
    feat = global_avgpool(x)                                  # (N, 2048) f32
    logits = matmul_bias(feat, params["fc"]["w"], params["fc"]["b"],
                         relu=False, out_dtype=jnp.float32)
    return logits                                             # (N, 1000)


if __name__ == "__main__":
    key = jax.random.PRNGKey(0)
    k_params, k_x = random.split(key)
    params = make_resnet50_params(k_params)
    x = random.normal(k_x, (2, 3, 32, 32), jnp.float32)  # NCHW, like PyTorch

    logits = resnet50_forward(x, params)
    logits = jax.block_until_ready(logits)
    assert logits.shape == (2, 1000), logits.shape
    assert bool(jnp.all(jnp.isfinite(logits)))
    print("KERNEL_OK")
</pallas_src>

<mosaic_0001>
module attributes {stable_mosaic.version = 11 : i64} {
  func.func @_mm_kernel(%arg0: i32, %arg1: i32, %arg2: i32, %arg3: memref<256x147xbf16, #tpu.memory_space<vmem>>, %arg4: memref<147x64xbf16, #tpu.memory_space<vmem>>, %arg5: memref<1x64xf32, #tpu.memory_space<vmem>>, %arg6: memref<256x64xbf16, #tpu.memory_space<vmem>>, %arg7: memref<256x64xf32, #tpu.memory_space<vmem>>) attributes {dimension_semantics = [#tpu.dimension_semantics<parallel>, #tpu.dimension_semantics<parallel>, #tpu.dimension_semantics<arbitrary>], iteration_bounds = array<i64: 2, 1, 1>, scalar_prefetch = 0 : i64, scratch_operands = 1 : i64, tpu.core_type = #tpu.core_type<tc>, window_params = [{transform_indices = @transform_0, window_bounds = array<i64: 256, 147>}, {transform_indices = @transform_1, window_bounds = array<i64: 147, 64>}, {transform_indices = @transform_2, window_bounds = array<i64: 1, 64>}, {transform_indices = @transform_3, window_bounds = array<i64: 256, 64>}]} {
    %c0_i32 = arith.constant 0 : i32
    %0 = arith.cmpi eq, %arg2, %c0_i32 : i32
    %1 = arith.extui %0 : i1 to i32
    %c0_i32_0 = arith.constant 0 : i32
    %2 = arith.cmpi ne, %1, %c0_i32_0 : i32
    scf.if %2 {
      %cst_10 = arith.constant 0.000000e+00 : f32
      %12 = vector.broadcast %cst_10 : f32 to vector<256x64xf32>
      %c0_11 = arith.constant 0 : index
      %c0_12 = arith.constant 0 : index
      %13 = vector.load %arg7[%c0_11, %c0_12] : memref<256x64xf32, #tpu.memory_space<vmem>>, vector<256x64xf32>
      tpu.vector_store %arg7[%c0_11, %c0_12], %12 {strides = array<i32>} : memref<256x64xf32, #tpu.memory_space<vmem>>, vector<256x64xf32>,
    } else {
    }
    %c0 = arith.constant 0 : index
    %c0_1 = arith.constant 0 : index
    %3 = vector.load %arg7[%c0, %c0_1] : memref<256x64xf32, #tpu.memory_space<vmem>>, vector<256x64xf32>
    %c0_2 = arith.constant 0 : index
    %c0_3 = arith.constant 0 : index
    %4 = vector.load %arg3[%c0_2, %c0_3] : memref<256x147xbf16, #tpu.memory_space<vmem>>, vector<256x147xbf16>
    %c0_4 = arith.constant 0 : index
    %c0_5 = arith.constant 0 : index
    %5 = vector.load %arg4[%c0_4, %c0_5] : memref<147x64xbf16, #tpu.memory_space<vmem>>, vector<147x64xbf16>
    %cst = arith.constant dense<0.000000e+00> : vector<256x64xf32>
    %6 = tpu.matmul %4, %5, %cst {dimension_numbers = #tpu.dot_dimension_numbers<[1], [0], [0], [1], [0, 0, 1, 1], [], []>} : vector<256x147xbf16>, vector<147x64xbf16>, vector<256x64xf32> -> vector<256x64xf32>
    %7 = arith.addf %3, %6 : vector<256x64xf32>
    %c0_6 = arith.constant 0 : index
    %c0_7 = arith.constant 0 : index
    %8 = vector.load %arg7[%c0_6, %c0_7] : memref<256x64xf32, #tpu.memory_space<vmem>>, vector<256x64xf32>
    tpu.vector_store %arg7[%c0_6, %c0_7], %7 {strides = array<i32>} : memref<256x64xf32, #tpu.memory_space<vmem>>, vector<256x64xf32>,
    %c0_i32_8 = arith.constant 0 : i32
    %9 = arith.cmpi eq, %arg2, %c0_i32_8 : i32
    %10 = arith.extui %9 : i1 to i32
    %c0_i32_9 = arith.constant 0 : i32
    %11 = arith.cmpi ne, %10, %c0_i32_9 : i32
    scf.if %11 {
      %c0_10 = arith.constant 0 : index
      %c0_11 = arith.constant 0 : index
      %12 = vector.load %arg7[%c0_10, %c0_11] : memref<256x64xf32, #tpu.memory_space<vmem>>, vector<256x64xf32>
      %c0_12 = arith.constant 0 : index
      %c0_13 = arith.constant 0 : index
      %13 = vector.load %arg5[%c0_12, %c0_13] : memref<1x64xf32, #tpu.memory_space<vmem>>, vector<1x64xf32>
      %14 = vector.broadcast %13 : vector<1x64xf32> to vector<256x64xf32>
      %15 = arith.addf %12, %14 : vector<256x64xf32>
      %cst_14 = arith.constant 0.000000e+00 : f32
      %16 = vector.broadcast %cst_14 : f32 to vector<256x64xf32>
      %17 = arith.maximumf %15, %16 : vector<256x64xf32>
      %18 = arith.truncf %17 : vector<256x64xf32> to vector<256x64xbf16>
      %c0_15 = arith.constant 0 : index
      %c0_16 = arith.constant 0 : index
      %19 = vector.load %arg6[%c0_15, %c0_16] : memref<256x64xbf16, #tpu.memory_space<vmem>>, vector<256x64xbf16>
      tpu.vector_store %arg6[%c0_15, %c0_16], %18 {strides = array<i32>} : memref<256x64xbf16, #tpu.memory_space<vmem>>, vector<256x64xbf16>,
    } else {
    }
    return
  }
  func.func @transform_0(%arg0: i32, %arg1: i32, %arg2: i32) -> (i32, i32) {
    %c0_i32 = arith.constant 0 : i32
    return %arg0, %arg2 : i32, i32
  }
  func.func @transform_1(%arg0: i32, %arg1: i32, %arg2: i32) -> (i32, i32) {
    %c0_i32 = arith.constant 0 : i32
    return %arg2, %arg1 : i32, i32
  }
  func.func @transform_2(%arg0: i32, %arg1: i32, %arg2: i32) -> (i32, i32) {
    %c0_i32 = arith.constant 0 : i32
    %c0_i32_0 = arith.constant 0 : i32
    return %c0_i32, %arg1 : i32, i32
  }
  func.func @transform_3(%arg0: i32, %arg1: i32, %arg2: i32) -> (i32, i32) {
    %c0_i32 = arith.constant 0 : i32
    return %arg0, %arg1 : i32, i32
  }
}

</mosaic_0001>

<bundles_post_ra>
// kernel: tpu_custom_call.1
= control target key start
LH: loop header
LB: loop body
LE: loop exit
PB: predicated region body
PF: predicated region fallthrough
CT: control target
= control target key end

     0   :  { %s1542_s12 = smov 0   ;;  %s1544_s13 = smov 0   ;;  %s1848_s0 = inlined_call_operand.vmem [shape: bf16[512,147], index: 0, kind: input, shape index: {}]   ;;  %s1849_s1 = inlined_call_operand.vmem [shape: bf16[147,64], index: 1, kind: input, shape index: {}]   ;;  %s1850_s2 = inlined_call_operand.vmem [shape: f32[1,64], index: 2, kind: input, shape index: {}]   ;;  %s1851_s3 = inlined_call_operand.vmem [shape: bf16[512,64], index: 3, kind: output, shape index: {}]  }
   0x1   :  { %s1546_s14 = smov 0  }
   0x2 LB: > { %s32_s15 = sadd.s32 1, %s1513_s13  ;;  %p1258_p0 = scmp.ge.s32.totalorder %s1517_s14, 1  ;;  %s1517_s14 = sphi %s1546_s14, %s13_s14   ;;  %s1513_s13 = sphi %s1544_s13, %s1853_s13   ;;  %s1509_s12 = sphi %s1542_s12, %s1852_s12  }
   0x3   : > { %p34_p1 = scmp.ge.s32.totalorder %s32_s15, 2  ;;  %p191_p2 = scmp.lt.s32.totalorder %s1517_s14, 3 }
   0x5   : > { %s1855_s15 = smov (%p34_p1, %s32_s15), 0  ;;  %p192_p3 = pnand %p1258_p0, %p191_p2 }
   0x6   : > { %v1437_v0 = vld [vmem:[%s1849_s1] sm:$0xff] (!%p192_p3)   ;;  %v1519_v1 = vmov (!%p192_p3), 0   ;;  %v1438_v2 = vld [vmem:[%s1849_s1 + $0x8] sm:$0xff] (!%p192_p3)   ;;  %v1439_v3 = vld [vmem:[%s1849_s1 + $0x10] sm:$0xff] (!%p192_p3)   ;;  %s1259_s22 = sshll.u32 (!%p192_p3), %s1509_s12, 5  ;;  %vm272_vm0 = vcmask (!%p192_p3), 523264  }
   0x7   : > { %195 = sbr.rel (%p192_p3) target bundleno = 337 (0x151), region = 32  ;;  %645 = vmatprep.subr.bf16.mxu0 (!%p192_p3), %v1519_v1  ;;  %1390 = vmatprep.subr.bf16.mxu1 (!%p192_p3), %v1519_v1  ;;  %p236_p4 = scmp.lt.s32.totalorder (!%p192_p3), %s1259_s22, 63  ;;  %v1440_v4 = vld [vmem:[%s1849_s1 + $0x18] sm:$0xff] (!%p192_p3)   ;;  %v1520_v5 = vmov (!%p192_p3), 0.0   ;;  %v1441_v6 = vld [vmem:[%s1849_s1 + $0x20] sm:$0xff] (!%p192_p3)   ;;  %vm589_vm1 = vcmask (!%p192_p3), 154624  }
   0x8   : > { %646 = vmatpush1.bf16.msra.mxu0 (!%p192_p3), %v1437_v0  ;;  %1400 = vmatpush1.bf16.msra.mxu1 (!%p192_p3), %v1437_v0  ;;  %273 = vst.msk [vmem:[#allocation2] sm:$0xff] (!%p192_p3), %vm272_vm0, %v1520_v5  ;;  %274 = vst.msk [vmem:[#allocation2 + $0x8] sm:$0xff] (!%p192_p3), %vm272_vm0, %v1520_v5  ;;  %v1442_v9 = vld [vmem:[%s1849_s1 + $0x28] sm:$0xff] (!%p192_p3)   ;;  %v1443_v10 = vld [vmem:[%s1849_s1 + $0x30] sm:$0xff] (!%p192_p3)   ;;  %vm638_vm2 = vcmask (!%p192_p3), 1040384   ;;  %vm639_vm3 = vcmask (!%p192_p3), 1041408  }
   0x9   : > { %647 = vmatprep.subr.bf16.mxu0 (!%p192_p3), %v1519_v1  ;;  %1391 = vmatprep.subr.bf16.mxu1 (!%p192_p3), %v1519_v1  ;;  %275 = vst.msk [vmem:[#allocation2 + $0x10] sm:$0xff] (!%p192_p3), %vm272_vm0, %v1520_v5  ;;  %276 = vst.msk [vmem:[#allocation2 + $0x18] sm:$0xff] (!%p192_p3), %vm272_vm0, %v1520_v5  ;;  %v1444_v11 = vld [vmem:[%s1849_s1 + $0x38] sm:$0xff] (!%p192_p3)   ;;  %v1521_v12 = vmov (!%p192_p3), 65535   ;;  %v1445_v14 = vld [vmem:[%s1849_s1 + $0x40] sm:$0xff] (!%p192_p3)   ;;  %vm1105_vm4 = vcmask (!%p192_p3), 519168  }
   0xa   : > { %277 = vst.msk [vmem:[#allocation2 + $0x20] sm:$0xff] (!%p192_p3), %vm272_vm0, %v1520_v5  ;;  %278 = vst.msk [vmem:[#allocation2 + $0x28] sm:$0xff] (!%p192_p3), %vm272_vm0, %v1520_v5  ;;  %v640_v13 = vsel (!%p192_p3), %vm638_vm2, 4294967295, %v1521_v12  ;;  %v1446_v15 = vld [vmem:[%s1849_s1 + $0x48] ss:$0 sps:$4 sm:$0x33] (!%p192_p3)  }
   0xb   : > { %279 = vst.msk [vmem:[#allocation2 + $0x30] sm:$0xff] (!%p192_p3), %vm272_vm0, %v1520_v5  ;;  %280 = vst.msk [vmem:[#allocation2 + $0x38] sm:$0xff] (!%p192_p3), %vm272_vm0, %v1520_v5  ;;  %v641_v16 = vsel (!%p192_p3), %vm639_vm3, %v640_v13, 0 }
   0xc   : > { %648 = vmatpush1.bf16.msra.mxu0 (!%p192_p3), %v1438_v2  ;;  %1401 = vmatpush1.bf16.msra.mxu1 (!%p192_p3), %v1438_v2  ;;  %281 = vst.msk [vmem:[#allocation2 + $0x40] sm:$0xff] (!%p192_p3), %vm272_vm0, %v1520_v5  ;;  %282 = vst.msk [vmem:[#allocation2 + $0x48] sm:$0xff] (!%p192_p3), %vm272_vm0, %v1520_v5  ;;  %v643_v17 = vand.u32 (!%p192_p3), %v1446_v15, %v641_v16  ;;  %v1707_v2 = vld [vmem:[%s1850_s2] ss:$0 sm:$0xff] (!%p192_p3) }
   0xd   : > { %649 = vmatprep.subr.bf16.mxu0 (!%p192_p3), %v1519_v1  ;;  %1392 = vmatprep.subr.bf16.mxu1 (!%p192_p3), %v1519_v1  ;;  %283 = vst.msk [vmem:[#allocation2 + $0x50] sm:$0xff] (!%p192_p3), %vm272_vm0, %v1520_v5  ;;  %284 = vst.msk [vmem:[#allocation2 + $0x58] sm:$0xff] (!%p192_p3), %vm272_vm0, %v1520_v5 }
   0xe   : > { %s1857_s22 = smov (!%p236_p4, %s1259_s22), 63  ;;  %285 = vst.msk [vmem:[#allocation2 + $0x60] sm:$0xff] %vm272_vm0, %v1520_v5  ;;  %286 = vst.msk [vmem:[#allocation2 + $0x68] sm:$0xff] %vm272_vm0, %v1520_v5 }
   0xf   : > { %s1357_s25 = sshll.u32 %s1857_s22, 3  ;;  %287 = vst.msk [vmem:[#allocation2 + $0x70] sm:$0xff] %vm272_vm0, %v1520_v5  ;;  %288 = vst.msk [vmem:[#allocation2 + $0x78] sm:$0xff] %vm272_vm0, %v1520_v5  ;;  %v305_v48 = vld [vmem:[#allocation2] sm:$0xff]  ;;  %v306_v52 = vld [vmem:[#allocation2 + $0x8] sm:$0xff]  ;;  %s1263_s19 = sshll.u32 %s1857_s22, 2 }
  0x10   : > { %650 = vmatpush1.bf16.msra.mxu0 %v1439_v3  ;;  %1402 = vmatpush1.bf16.msra.mxu1 %v1439_v3  ;;  %289 = vst.msk [vmem:[#allocation2 + $0x80] sm:$0xff] %vm272_vm0, %v1520_v5  ;;  %290 = vst.msk [vmem:[#allocation2 + $0x88] sm:$0xff] %vm272_vm0, %v1520_v5  ;;  %s1620_s28 = scalar_lea.vmem %s1848_s0, %s1357_s25  ;;  %v307_v0 = vld [vmem:[#allocation2 + $0x10] sm:$0xff]  ;;  %s1721_s22 = scalar_lea.vmem %s1851_s3, %s1263_s19 }
  0x11   : > { %651 = vmatprep.subr.bf16.mxu0 %v1519_v1  ;;  %1393 = vmatprep.subr.bf16.mxu1 %v1519_v1  ;;  %291 = vst.msk [vmem:[#allocation2 + $0x90] sm:$0xff] %vm272_vm0, %v1520_v5  ;;  %292 = vst.msk [vmem:[#allocation2 + $0x98] sm:$0xff] %vm272_vm0, %v1520_v5  ;;  %v1449_v7 = vld [vmem:[%s1620_s28 + $0x4] ss:$8 sps:$4 sm:$0xff]   ;;  %v1447_v18 = vld [vmem:[%s1620_s28] ss:$8 sps:$4 sm:$0xff]  }
  0x12   : > { %293 = vst.msk [vmem:[#allocation2 + $0xa0] sm:$0xff] %vm272_vm0, %v1520_v5  ;;  %294 = vst.msk [vmem:[#allocation2 + $0xa8] sm:$0xff] %vm272_vm0, %v1520_v5  ;;  %v1452_v8 = vld [vmem:[%s1620_s28 + $0x84] ss:$8 sps:$4 sm:$0xff]   ;;  %1306 = vmatprep.mubr.msk.bf16.mxu0 %vm589_vm1, %v1449_v7  ;;  %v1450_v19 = vld [vmem:[%s1620_s28 + $0x80] ss:$8 sps:$4 sm:$0xff]  }
  0x13   : > { %295 = vst.msk [vmem:[#allocation2 + $0xb0] sm:$0xff] %vm272_vm0, %v1520_v5  ;;  %296 = vst.msk [vmem:[#allocation2 + $0xb8] sm:$0xff] %vm272_vm0, %v1520_v5  ;;  %1314 = vmatprep.mubr.msk.bf16.mxu1 %vm589_vm1, %v1452_v8  ;;  %v1453_v20 = vld [vmem:[%s1620_s28 + $0x14] ss:$8 sps:$4 sm:$0xff]   ;;  %v1457_v22 = vld [vmem:[%s1620_s28 + $0x10] ss:$8 sps:$4 sm:$0xff]  }
  0x14   : > { %297 = vst.msk [vmem:[#allocation2 + $0xc0] sm:$0xff] %vm272_vm0, %v1520_v5  ;;  %298 = vst.msk [vmem:[#allocation2 + $0xc8] sm:$0xff] %vm272_vm0, %v1520_v5  ;;  %652 = vmatpush1.bf16.msra.mxu0 %v1440_v4  ;;  %1403 = vmatpush1.bf16.msra.mxu1 %v1440_v4  ;;  %v1455_v21 = vld [vmem:[%s1620_s28 + $0x94] ss:$8 sps:$4 sm:$0xff]   ;;  %v1458_v23 = vld [vmem:[%s1620_s28 + $0x90] ss:$8 sps:$4 sm:$0xff]  }
  0x15   : > { %299 = vst.msk [vmem:[#allocation2 + $0xd0] sm:$0xff] %vm272_vm0, %v1520_v5  ;;  %300 = vst.msk [vmem:[#allocation2 + $0xd8] sm:$0xff] %vm272_vm0, %v1520_v5  ;;  %653 = vmatprep.subr.bf16.mxu0 %v1519_v1  ;;  %1394 = vmatprep.subr.bf16.mxu1 %v1519_v1  ;;  %v1459_v24 = vld [vmem:[%s1620_s28 + $0x24] ss:$8 sps:$4 sm:$0xff]   ;;  %v1463_v26 = vld [vmem:[%s1620_s28 + $0x20] ss:$8 sps:$4 sm:$0xff]  }
  0x16   : > { %301 = vst.msk [vmem:[#allocation2 + $0xe0] sm:$0xff] %vm272_vm0, %v1520_v5  ;;  %302 = vst.msk [vmem:[#allocation2 + $0xe8] sm:$0xff] %vm272_vm0, %v1520_v5  ;;  %v1461_v25 = vld [vmem:[%s1620_s28 + $0xa4] ss:$8 sps:$4 sm:$0xff]   ;;  %v1464_v27 = vld [vmem:[%s1620_s28 + $0xa0] ss:$8 sps:$4 sm:$0xff]  }
  0x17   : > { %303 = vst.msk [vmem:[#allocation2 + $0xf0] sm:$0xff] %vm272_vm0, %v1520_v5  ;;  %304 = vst.msk [vmem:[#allocation2 + $0xf8] sm:$0xff] %vm272_vm0, %v1520_v5  ;;  %v1465_v28 = vld [vmem:[%s1620_s28 + $0x34] ss:$8 sps:$4 sm:$0xff]   ;;  %v1469_v30 = vld [vmem:[%s1620_s28 + $0x30] ss:$8 sps:$4 sm:$0xff]  }
  0x18   : > { %654 = vmatpush1.bf16.msra.mxu0 %v1441_v6  ;;  %1404 = vmatpush1.bf16.msra.mxu1 %v1441_v6  ;;  %v1467_v29 = vld [vmem:[%s1620_s28 + $0xb4] ss:$8 sps:$4 sm:$0xff]   ;;  %v1470_v31 = vld [vmem:[%s1620_s28 + $0xb0] ss:$8 sps:$4 sm:$0xff]   ;;  %v1471_v32 = vld [vmem:[%s1620_s28 + $0x44] ss:$8 sps:$4 sm:$0xff]  }
  0x19   : > { %655 = vmatprep.subr.bf16.mxu0 %v1519_v1  ;;  %1395 = vmatprep.subr.bf16.mxu1 %v1519_v1  ;;  %v1473_v33 = vld [vmem:[%s1620_s28 + $0xc4] ss:$8 sps:$4 sm:$0xff]   ;;  %v1475_v34 = vld [vmem:[%s1620_s28 + $0x40] ss:$8 sps:$4 sm:$0xff]   ;;  %v1477_v36 = vld [vmem:[%s1620_s28 + $0x54] ss:$8 sps:$4 sm:$0xff]  }
  0x1a   : > { %v1476_v35 = vld [vmem:[%s1620_s28 + $0xc0] ss:$8 sps:$4 sm:$0xff]   ;;  %v1479_v37 = vld [vmem:[%s1620_s28 + $0xd4] ss:$8 sps:$4 sm:$0xff]   ;;  %v1481_v38 = vld [vmem:[%s1620_s28 + $0x50] ss:$8 sps:$4 sm:$0xff]  }
  0x1b   : > { %v1482_v39 = vld [vmem:[%s1620_s28 + $0xd0] ss:$8 sps:$4 sm:$0xff]   ;;  %v1483_v40 = vld [vmem:[%s1620_s28 + $0x64] ss:$8 sps:$4 sm:$0xff]   ;;  %v1487_v42 = vld [vmem:[%s1620_s28 + $0x60] ss:$8 sps:$4 sm:$0xff]  }
  0x1c   : > { %656 = vmatpush1.bf16.msra.mxu0 %v1442_v9  ;;  %1405 = vmatpush1.bf16.msra.mxu1 %v1442_v9  ;;  %v1485_v41 = vld [vmem:[%s1620_s28 + $0xe4] ss:$8 sps:$4 sm:$0xff]   ;;  %v1488_v43 = vld [vmem:[%s1620_s28 + $0xe0] ss:$8 sps:$4 sm:$0xff]   ;;  %v1489_v44 = vld [vmem:[%s1620_s28 + $0x74] ss:$8 sps:$4 sm:$0xff]  }
  0x1d   : > { %657 = vmatprep.subr.bf16.mxu0 %v1519_v1  ;;  %1396 = vmatprep.subr.bf16.mxu1 %v1519_v1  ;;  %v1491_v45 = vld [vmem:[%s1620_s28 + $0xf4] ss:$8 sps:$4 sm:$0xff]   ;;  %v1493_v46 = vld [vmem:[%s1620_s28 + $0x70] ss:$8 sps:$4 sm:$0xff]   ;;  %v321_v49 = vld [vmem:[#allocation2 + $0x80] sm:$0xff] }
  0x1e   : > { %v1494_v47 = vld [vmem:[%s1620_s28 + $0xf0] ss:$8 sps:$4 sm:$0xff]   ;;  %v322_v53 = vld [vmem:[#allocation2 + $0x88] sm:$0xff] }
  0x1f   : > { %v308_v5 = vld [vmem:[#allocation2 + $0x18] sm:$0xff] }
  0x20   : > { %658 = vmatpush1.bf16.msra.mxu0 %v1443_v10  ;;  %1406 = vmatpush1.bf16.msra.mxu1 %v1443_v10  ;;  %v324_v6 = vld [vmem:[#allocation2 + $0x98] sm:$0xff] }
  0x21   : > { %659 = vmatprep.subr.bf16.mxu0 %v1519_v1  ;;  %1397 = vmatprep.subr.bf16.mxu1 %v1519_v1 }
  0x24   : > { %660 = vmatpush1.bf16.msra.mxu0 %v1444_v11  ;;  %1407 = vmatpush1.bf16.msra.mxu1 %v1444_v11 }
  0x25   : > { %661 = vmatprep.subr.bf16.mxu0 %v1519_v1  ;;  %1398 = vmatprep.subr.bf16.mxu1 %v1519_v1 }
  0x28   : > { %662 = vmatpush1.bf16.msra.mxu0 %v1445_v14  ;;  %1408 = vmatpush1.bf16.msra.mxu1 %v1445_v14 }
  0x29   : > { %663 = vmatprep.subr.bf16.mxu0 %v1519_v1  ;;  %1399 = vmatprep.subr.bf16.mxu1 %v1519_v1  ;;  %v323_v1 = vld [vmem:[#allocation2 + $0x90] sm:$0xff] }
  0x2c   : > { %664 = vmatpush1.bf16.msra.mxu0 %v643_v17  ;;  %1409 = vmatpush1.bf16.msra.mxu1 %v643_v17 }
  0x2f   : > { %678 = vmatmul.mubr.bf16.vlgmr.msra.gmra.mrb[0].mxu0 %v1447_v18  ;;  %742 = vmatmul.mubr.bf16.vlgmr.msra.gmra.mrb[0].mxu1 %v1450_v19 }
  0x30   : > { %1307 = vmatprep.mubr.msk.bf16.mxu0 %vm589_vm1, %v1453_v20  ;;  %1315 = vmatprep.mubr.msk.bf16.mxu1 %vm589_vm1, %v1455_v21 }
  0x37   : > { %686 = vmatmul.mubr.bf16.gmra.mrb[4].mxu0 %v1457_v22  ;;  %750 = vmatmul.mubr.bf16.gmra.mrb[4].mxu1 %v1458_v23 }
  0x38   : > { %1308 = vmatprep.mubr.msk.bf16.mxu0 %vm589_vm1, %v1459_v24  ;;  %1316 = vmatprep.mubr.msk.bf16.mxu1 %vm589_vm1, %v1461_v25 }
  0x3f   : > { %694 = vmatmul.mubr.bf16.gmra.mrb[8].mxu0 %v1463_v26  ;;  %758 = vmatmul.mubr.bf16.gmra.mrb[8].mxu1 %v1464_v27  ;;  %v309_v27 = vld [vmem:[#allocation2 + $0x20] sm:$0xff] }
  0x40   : > { %1309 = vmatprep.mubr.msk.bf16.mxu0 %vm589_vm1, %v1465_v28  ;;  %1317 = vmatprep.mubr.msk.bf16.mxu1 %vm589_vm1, %v1467_v29  ;;  %v325_v28 = vld [vmem:[#allocation2 + $0xa0] sm:$0xff] }
  0x47   : > { %702 = vmatmul.mubr.bf16.gmra.mrb[12].mxu0 %v1469_v30  ;;  %766 = vmatmul.mubr.bf16.gmra.mrb[12].mxu1 %v1470_v31 }
  0x48   : > { %1310 = vmatprep.mubr.msk.bf16.mxu0 %vm589_vm1, %v1471_v32  ;;  %1318 = vmatprep.mubr.msk.bf16.mxu1 %vm589_vm1, %v1473_v33 }
  0x4f   : > { %710 = vmatmul.mubr.bf16.gmra.mrb[16].mxu0 %v1475_v34  ;;  %774 = vmatmul.mubr.bf16.gmra.mrb[16].mxu1 %v1476_v35  ;;  %v310_v35 = vld [vmem:[#allocation2 + $0x28] sm:$0xff] }
  0x50   : > { %1311 = vmatprep.mubr.msk.bf16.mxu0 %vm589_vm1, %v1477_v36  ;;  %1319 = vmatprep.mubr.msk.bf16.mxu1 %vm589_vm1, %v1479_v37  ;;  %v326_v36 = vld [vmem:[#allocation2 + $0xa8] sm:$0xff] }
  0x57   : > { %718 = vmatmul.mubr.bf16.gmra.mrb[20].mxu0 %v1481_v38  ;;  %782 = vmatmul.mubr.bf16.gmra.mrb[20].mxu1 %v1482_v39 }
  0x58   : > { %1312 = vmatprep.mubr.msk.bf16.mxu0 %vm589_vm1, %v1483_v40  ;;  %1320 = vmatprep.mubr.msk.bf16.mxu1 %vm589_vm1, %v1485_v41 }
  0x5f   : > { %726 = vmatmul.mubr.bf16.gmra.mrb[24].mxu0 %v1487_v42  ;;  %790 = vmatmul.mubr.bf16.gmra.mrb[24].mxu1 %v1488_v43 }
  0x60   : > { %1313 = vmatprep.mubr.msk.bf16.mxu0 %vm589_vm1, %v1489_v44  ;;  %1321 = vmatprep.mubr.msk.bf16.mxu1 %vm589_vm1, %v1491_v45 }
  0x67   : > { %734 = vmatmul.mubr.bf16.gmra.mrb[28].mxu0 %v1493_v46  ;;  %798 = vmatmul.mubr.bf16.gmra.mrb[28].mxu1 %v1494_v47 }
 0x102   : > { %v679_v50 = vpop.f32.mrb[0].mxu0  ;;  %v743_v51 = vpop.f32.mrb[0].mxu1 }
 0x103   : > { %v806_v54 = vadd.f32 %v679_v50, %v305_v48  ;;  %v822_v55 = vadd.f32 %v743_v51, %v321_v49  ;;  %v681_v56 = vpop.f32.mrb[1].mxu0  ;;  %v745_v57 = vpop.f32.mrb[1].mxu1 }
 0x104   : > { %v682_v58 = vpop.f32.mrb[2].mxu0  ;;  %v746_v59 = vpop.f32.mrb[2].mxu1 }
 0x105   : > { %839 = vst.msk [vmem:[#allocation2] sm:$0xff] %vm272_vm0, %v806_v54  ;;  %855 = vst.msk [vmem:[#allocation2 + $0x80] sm:$0xff] %vm272_vm0, %v822_v55  ;;  %v807_v60 = vadd.f32 %v682_v58, %v306_v52  ;;  %v823_v61 = vadd.f32 %v746_v59, %v322_v53  ;;  %v684_v62 = vpop.f32.mrb[3].mxu0  ;;  %v748_v63 = vpop.f32.mrb[3].mxu1  ;;  %v311_v59 = vld [vmem:[#allocation2 + $0x30] sm:$0xff] }
 0x107   : > { %840 = vst.msk [vmem:[#allocation2 + $0x8] sm:$0xff] %vm272_vm0, %v807_v60  ;;  %856 = vst.msk [vmem:[#allocation2 + $0x88] sm:$0xff] %vm272_vm0, %v823_v61  ;;  %v327_v60 = vld [vmem:[#allocation2 + $0xb0] sm:$0xff] }
 0x10a   : > { %v687_v3 = vpop.f32.mrb[4].mxu0  ;;  %v751_v4 = vpop.f32.mrb[4].mxu1 }
 0x10b   : > { %v808_v7 = vadd.f32 %v687_v3, %v307_v0  ;;  %v824_v8 = vadd.f32 %v751_v4, %v323_v1  ;;  %v689_v9 = vpop.f32.mrb[5].mxu0  ;;  %v753_v10 = vpop.f32.mrb[5].mxu1  ;;  %v312_v4 = vld [vmem:[#allocation2 + $0x38] sm:$0xff] }
 0x10c   : > { %v874_v11 = vld [vmem:[#allocation2] sm:$0xff]  ;;  %v690_v13 = vpop.f32.mrb[6].mxu0  ;;  %v754_v14 = vpop.f32.mrb[6].mxu1 }
 0x10d   : > { %v890_v12 = vld [vmem:[#allocation2 + $0x80] sm:$0xff]  ;;  %v913_v15 = vadd.f32 %v1707_v2, %v874_v11  ;;  %841 = vst.msk [vmem:[#allocation2 + $0x10] sm:$0xff] %vm272_vm0, %v808_v7  ;;  %857 = vst.msk [vmem:[#allocation2 + $0x90] sm:$0xff] %vm272_vm0, %v824_v8  ;;  %v809_v17 = vadd.f32 %v690_v13, %v308_v5  ;;  %v825_v18 = vadd.f32 %v754_v14, %v324_v6  ;;  %v692_v19 = vpop.f32.mrb[7].mxu0  ;;  %v756_v20 = vpop.f32.mrb[7].mxu1  ;;  %v328_v5 = vld [vmem:[#allocation2 + $0xb8] sm:$0xff] }
 0x10e   : > { %v929_v16 = vadd.f32 %v1707_v2, %v890_v12  ;;  %v875_v21 = vld [vmem:[#allocation2 + $0x8] sm:$0xff] }
 0x10f   : > { %v891_v22 = vld [vmem:[#allocation2 + $0x88] sm:$0xff]  ;;  %v945_v23 = vmax.f32 %v913_v15, 0.0  ;;  %v914_v25 = vadd.f32 %v1707_v2, %v875_v21  ;;  %842 = vst.msk [vmem:[#allocation2 + $0x18] sm:$0xff] %vm272_vm0, %v809_v17  ;;  %858 = vst.msk [vmem:[#allocation2 + $0x98] sm:$0xff] %vm272_vm0, %v825_v18 }
 0x110   : > { %v961_v24 = vmax.f32 %v929_v16, 0.0  ;;  %v930_v26 = vadd.f32 %v1707_v2, %v891_v22 }
 0x111   : > { %v1358_v29 = vpack.c.bf16 %v945_v23, %v945_v23  ;;  %v946_v31 = vmax.f32 %v914_v25, 0.0 }
 0x112   : > { %v1374_v30 = vpack.c.bf16 %v961_v24, %v961_v24  ;;  %v962_v32 = vmax.f32 %v930_v26, 0.0  ;;  %v695_v33 = vpop.f32.mrb[8].mxu0  ;;  %v759_v34 = vpop.f32.mrb[8].mxu1 }
 0x113   : > { %1106 = vst.msk [vmem:[%s1721_s22] sm:$0xf] %vm1105_vm4, %v1358_v29  ;;  %v1359_v37 = vpack.c.bf16 %v946_v31, %v946_v31  ;;  %v810_v39 = vadd.f32 %v695_v33, %v309_v27  ;;  %v826_v40 = vadd.f32 %v759_v34, %v325_v28  ;;  %v697_v41 = vpop.f32.mrb[9].mxu0  ;;  %v761_v42 = vpop.f32.mrb[9].mxu1  ;;  %v313_v28 = vld [vmem:[#allocation2 + $0x40] sm:$0xff] }
 0x114   : > { %1122 = vst.msk [vmem:[%s1721_s22 + $0x40] sm:$0xf] %vm1105_vm4, %v1374_v30  ;;  %v1375_v38 = vpack.c.bf16 %v962_v32, %v962_v32  ;;  %v876_v43 = vld [vmem:[#allocation2 + $0x10] sm:$0xff]  ;;  %v698_v45 = vpop.f32.mrb[10].mxu0  ;;  %v762_v46 = vpop.f32.mrb[10].mxu1  ;;  %v329_v29 = vld [vmem:[#allocation2 + $0xc0] sm:$0xff] }
 0x115   : > { %v892_v44 = vld [vmem:[#allocation2 + $0x90] sm:$0xff]  ;;  %1107 = vst.msk [vmem:[%s1721_s22 + $0x4] sm:$0xf] %vm1105_vm4, %v1359_v37  ;;  %v915_v47 = vadd.f32 %v1707_v2, %v876_v43  ;;  %v811_v49 = vadd.f32 %v698_v45, %v310_v35  ;;  %v827_v50 = vadd.f32 %v762_v46, %v326_v36  ;;  %v700_v51 = vpop.f32.mrb[11].mxu0  ;;  %v764_v52 = vpop.f32.mrb[11].mxu1  ;;  %v314_v36 = vld [vmem:[#allocation2 + $0x48] sm:$0xff] }
 0x116   : > { %1123 = vst.msk [vmem:[%s1721_s22 + $0x44] sm:$0xf] %vm1105_vm4, %v1375_v38  ;;  %v931_v48 = vadd.f32 %v1707_v2, %v892_v44  ;;  %v877_v53 = vld [vmem:[#allocation2 + $0x18] sm:$0xff]  ;;  %v330_v37 = vld [vmem:[#allocation2 + $0xc8] sm:$0xff] }
 0x117   : > { %843 = vst.msk [vmem:[#allocation2 + $0x20] sm:$0xff] %vm272_vm0, %v810_v39  ;;  %859 = vst.msk [vmem:[#allocation2 + $0xa0] sm:$0xff] %vm272_vm0, %v826_v40  ;;  %v893_v54 = vld [vmem:[#allocation2 + $0x98] sm:$0xff]  ;;  %v947_v55 = vmax.f32 %v915_v47, 0.0  ;;  %v916_v57 = vadd.f32 %v1707_v2, %v877_v53 }
 0x118   : > { %v963_v56 = vmax.f32 %v931_v48, 0.0  ;;  %v932_v58 = vadd.f32 %v1707_v2, %v893_v54  ;;  %844 = vst.msk [vmem:[#allocation2 + $0x28] sm:$0xff] %vm272_vm0, %v811_v49  ;;  %860 = vst.msk [vmem:[#allocation2 + $0xa8] sm:$0xff] %vm272_vm0, %v827_v50 }
 0x119   : > { %v1360_v61 = vpack.c.bf16 %v947_v55, %v947_v55  ;;  %v948_v63 = vmax.f32 %v916_v57, 0.0 }
 0x11a   : > { %v1376_v62 = vpack.c.bf16 %v963_v56, %v963_v56  ;;  %v964_v0 = vmax.f32 %v932_v58, 0.0  ;;  %v703_v1 = vpop.f32.mrb[12].mxu0  ;;  %v767_v3 = vpop.f32.mrb[12].mxu1 }
 0x11b   : > { %1108 = vst.msk [vmem:[%s1721_s22 + $0x8] sm:$0xf] %vm1105_vm4, %v1360_v61  ;;  %v1361_v6 = vpack.c.bf16 %v948_v63, %v948_v63  ;;  %v812_v8 = vadd.f32 %v703_v1, %v311_v59  ;;  %v828_v9 = vadd.f32 %v767_v3, %v327_v60  ;;  %v705_v10 = vpop.f32.mrb[13].mxu0  ;;  %v769_v11 = vpop.f32.mrb[13].mxu1  ;;  %v315_v60 = vld [vmem:[#allocation2 + $0x50] sm:$0xff] }
 0x11c   : > { %1124 = vst.msk [vmem:[%s1721_s22 + $0x48] sm:$0xf] %vm1105_vm4, %v1376_v62  ;;  %v1377_v7 = vpack.c.bf16 %v964_v0, %v964_v0  ;;  %v706_v14 = vpop.f32.mrb[14].mxu0  ;;  %v770_v15 = vpop.f32.mrb[14].mxu1  ;;  %v331_v61 = vld [vmem:[#allocation2 + $0xd0] sm:$0xff] }
 0x11d   : > { %1109 = vst.msk [vmem:[%s1721_s22 + $0xc] sm:$0xf] %vm1105_vm4, %v1361_v6  ;;  %v813_v18 = vadd.f32 %v706_v14, %v312_v4  ;;  %v829_v19 = vadd.f32 %v770_v15, %v328_v5  ;;  %v708_v20 = vpop.f32.mrb[15].mxu0  ;;  %v772_v21 = vpop.f32.mrb[15].mxu1  ;;  %v316_v5 = vld [vmem:[#allocation2 + $0x58] sm:$0xff] }
 0x11e   : > { %v878_v12 = vld [vmem:[#allocation2 + $0x20] sm:$0xff]  ;;  %1125 = vst.msk [vmem:[%s1721_s22 + $0x4c] sm:$0xf] %vm1105_vm4, %v1377_v7  ;;  %v332_v6 = vld [vmem:[#allocation2 + $0xd8] sm:$0xff] }
 0x11f   : > { %v894_v13 = vld [vmem:[#allocation2 + $0xa0] sm:$0xff]  ;;  %v917_v16 = vadd.f32 %v1707_v2, %v878_v12  ;;  %845 = vst.msk [vmem:[#allocation2 + $0x30] sm:$0xff] %vm272_vm0, %v812_v8  ;;  %861 = vst.msk [vmem:[#allocation2 + $0xb0] sm:$0xff] %vm272_vm0, %v828_v9  ;;  %v879_v22 = vld [vmem:[#allocation2 + $0x28] sm:$0xff] }
 0x120   : > { %v933_v17 = vadd.f32 %v1707_v2, %v894_v13  ;;  %v895_v23 = vld [vmem:[#allocation2 + $0xa8] sm:$0xff]  ;;  %v918_v26 = vadd.f32 %v1707_v2, %v879_v22  ;;  %846 = vst.msk [vmem:[#allocation2 + $0x38] sm:$0xff] %vm272_vm0, %v813_v18  ;;  %862 = vst.msk [vmem:[#allocation2 + $0xb8] sm:$0xff] %vm272_vm0, %v829_v19 }
 0x121   : > { %v949_v24 = vmax.f32 %v917_v16, 0.0  ;;  %v934_v27 = vadd.f32 %v1707_v2, %v895_v23 }
 0x122   : > { %v965_v25 = vmax.f32 %v933_v17, 0.0  ;;  %v950_v32 = vmax.f32 %v918_v26, 0.0  ;;  %v711_v34 = vpop.f32.mrb[16].mxu0  ;;  %v775_v35 = vpop.f32.mrb[16].mxu1 }
 0x123   : > { %v1362_v30 = vpack.c.bf16 %v949_v24, %v949_v24  ;;  %v966_v33 = vmax.f32 %v934_v27, 0.0  ;;  %v814_v40 = vadd.f32 %v711_v34, %v313_v28  ;;  %v830_v41 = vadd.f32 %v775_v35, %v329_v29  ;;  %v713_v42 = vpop.f32.mrb[17].mxu0  ;;  %v777_v43 = vpop.f32.mrb[17].mxu1  ;;  %v317_v29 = vld [vmem:[#allocation2 + $0x60] sm:$0xff] }
 0x124   : > { %v1378_v31 = vpack.c.bf16 %v965_v25, %v965_v25  ;;  %v1363_v38 = vpack.c.bf16 %v950_v32, %v950_v32  ;;  %v714_v46 = vpop.f32.mrb[18].mxu0  ;;  %v778_v47 = vpop.f32.mrb[18].mxu1 }
 0x125   : > { %1110 = vst.msk [vmem:[%s1721_s22 + $0x10] sm:$0xf] %vm1105_vm4, %v1362_v30  ;;  %v1379_v39 = vpack.c.bf16 %v966_v33, %v966_v33  ;;  %v815_v50 = vadd.f32 %v714_v46, %v314_v36  ;;  %v831_v51 = vadd.f32 %v778_v47, %v330_v37  ;;  %v716_v52 = vpop.f32.mrb[19].mxu0  ;;  %v780_v53 = vpop.f32.mrb[19].mxu1  ;;  %v333_v30 = vld [vmem:[#allocation2 + $0xe0] sm:$0xff]  ;;  %v318_v37 = vld [vmem:[#allocation2 + $0x68] sm:$0xff] }
 0x126   : > { %1126 = vst.msk [vmem:[%s1721_s22 + $0x50] sm:$0xf] %vm1105_vm4, %v1378_v31  ;;  %v880_v44 = vld [vmem:[#allocation2 + $0x30] sm:$0xff]  ;;  %1111 = vst.msk [vmem:[%s1721_s22 + $0x14] sm:$0xf] %vm1105_vm4, %v1363_v38  ;;  %v334_v38 = vld [vmem:[#allocation2 + $0xe8] sm:$0xff] }
 0x127   : > { %v896_v45 = vld [vmem:[#allocation2 + $0xb0] sm:$0xff]  ;;  %1127 = vst.msk [vmem:[%s1721_s22 + $0x54] sm:$0xf] %vm1105_vm4, %v1379_v39  ;;  %v919_v48 = vadd.f32 %v1707_v2, %v880_v44  ;;  %v881_v54 = vld [vmem:[#allocation2 + $0x38] sm:$0xff] }
 0x128   : > { %v935_v49 = vadd.f32 %v1707_v2, %v896_v45  ;;  %847 = vst.msk [vmem:[#allocation2 + $0x40] sm:$0xff] %vm272_vm0, %v814_v40  ;;  %863 = vst.msk [vmem:[#allocation2 + $0xc0] sm:$0xff] %vm272_vm0, %v830_v41  ;;  %v897_v55 = vld [vmem:[#allocation2 + $0xb8] sm:$0xff]  ;;  %v920_v58 = vadd.f32 %v1707_v2, %v881_v54 }
 0x129   : > { %v951_v56 = vmax.f32 %v919_v48, 0.0  ;;  %v936_v59 = vadd.f32 %v1707_v2, %v897_v55  ;;  %848 = vst.msk [vmem:[#allocation2 + $0x48] sm:$0xff] %vm272_vm0, %v815_v50  ;;  %864 = vst.msk [vmem:[#allocation2 + $0xc8] sm:$0xff] %vm272_vm0, %v831_v51 }
 0x12a   : > { %v967_v57 = vmax.f32 %v935_v49, 0.0  ;;  %v952_v0 = vmax.f32 %v920_v58, 0.0  ;;  %v719_v3 = vpop.f32.mrb[20].mxu0  ;;  %v783_v4 = vpop.f32.mrb[20].mxu1 }
 0x12b   : > { %v1364_v62 = vpack.c.bf16 %v951_v56, %v951_v56  ;;  %v968_v1 = vmax.f32 %v936_v59, 0.0  ;;  %v816_v9 = vadd.f32 %v719_v3, %v315_v60  ;;  %v832_v10 = vadd.f32 %v783_v4, %v331_v61  ;;  %v721_v11 = vpop.f32.mrb[21].mxu0  ;;  %v785_v12 = vpop.f32.mrb[21].mxu1  ;;  %v319_v61 = vld [vmem:[#allocation2 + $0x70] sm:$0xff] }
 0x12c   : > { %v1380_v63 = vpack.c.bf16 %v967_v57, %v967_v57  ;;  %v1365_v7 = vpack.c.bf16 %v952_v0, %v952_v0  ;;  %v722_v15 = vpop.f32.mrb[22].mxu0  ;;  %v786_v16 = vpop.f32.mrb[22].mxu1 }
 0x12d   : > { %1112 = vst.msk [vmem:[%s1721_s22 + $0x18] sm:$0xf] %vm1105_vm4, %v1364_v62  ;;  %v1381_v8 = vpack.c.bf16 %v968_v1, %v968_v1  ;;  %v817_v19 = vadd.f32 %v722_v15, %v316_v5  ;;  %v833_v20 = vadd.f32 %v786_v16, %v332_v6  ;;  %v724_v21 = vpop.f32.mrb[23].mxu0  ;;  %v788_v22 = vpop.f32.mrb[23].mxu1  ;;  %v335_v62 = vld [vmem:[#allocation2 + $0xf0] sm:$0xff]  ;;  %v320_v6 = vld [vmem:[#allocation2 + $0x78] sm:$0xff] }
 0x12e   : > { %1128 = vst.msk [vmem:[%s1721_s22 + $0x58] sm:$0xf] %vm1105_vm4, %v1380_v63  ;;  %1113 = vst.msk [vmem:[%s1721_s22 + $0x1c] sm:$0xf] %vm1105_vm4, %v1365_v7  ;;  %v336_v7 = vld [vmem:[#allocation2 + $0xf8] sm:$0xff] }
 0x12f   : > { %v882_v13 = vld [vmem:[#allocation2 + $0x40] sm:$0xff]  ;;  %1129 = vst.msk [vmem:[%s1721_s22 + $0x5c] sm:$0xf] %vm1105_vm4, %v1381_v8 }
 0x130   : > { %v898_v14 = vld [vmem:[#allocation2 + $0xc0] sm:$0xff]  ;;  %v921_v17 = vadd.f32 %v1707_v2, %v882_v13  ;;  %849 = vst.msk [vmem:[#allocation2 + $0x50] sm:$0xff] %vm272_vm0, %v816_v9  ;;  %865 = vst.msk [vmem:[#allocation2 + $0xd0] sm:$0xff] %vm272_vm0, %v832_v10  ;;  %v883_v23 = vld [vmem:[#allocation2 + $0x48] sm:$0xff] }
 0x131   : > { %v937_v18 = vadd.f32 %v1707_v2, %v898_v14  ;;  %v899_v24 = vld [vmem:[#allocation2 + $0xc8] sm:$0xff]  ;;  %v922_v27 = vadd.f32 %v1707_v2, %v883_v23  ;;  %850 = vst.msk [vmem:[#allocation2 + $0x58] sm:$0xff] %vm272_vm0, %v817_v19  ;;  %866 = vst.msk [vmem:[#allocation2 + $0xd8] sm:$0xff] %vm272_vm0, %v833_v20 }
 0x132   : > { %v953_v25 = vmax.f32 %v921_v17, 0.0  ;;  %v938_v28 = vadd.f32 %v1707_v2, %v899_v24  ;;  %v727_v35 = vpop.f32.mrb[24].mxu0  ;;  %v791_v36 = vpop.f32.mrb[24].mxu1 }
 0x133   : > { %v969_v26 = vmax.f32 %v937_v18, 0.0  ;;  %v954_v33 = vmax.f32 %v922_v27, 0.0  ;;  %v818_v41 = vadd.f32 %v727_v35, %v317_v29  ;;  %v834_v42 = vadd.f32 %v791_v36, %v333_v30  ;;  %v729_v43 = vpop.f32.mrb[25].mxu0  ;;  %v793_v44 = vpop.f32.mrb[25].mxu1 }
 0x134   : > { %v1366_v31 = vpack.c.bf16 %v953_v25, %v953_v25  ;;  %v970_v34 = vmax.f32 %v938_v28, 0.0  ;;  %v730_v47 = vpop.f32.mrb[26].mxu0  ;;  %v794_v48 = vpop.f32.mrb[26].mxu1 }
 0x135   : > { %v1382_v32 = vpack.c.bf16 %v969_v26, %v969_v26  ;;  %v1367_v39 = vpack.c.bf16 %v954_v33, %v954_v33  ;;  %851 = vst.msk [vmem:[#allocation2 + $0x60] sm:$0xff] %vm272_vm0, %v818_v41  ;;  %867 = vst.msk [vmem:[#allocation2 + $0xe0] sm:$0xff] %vm272_vm0, %v834_v42  ;;  %v819_v51 = vadd.f32 %v730_v47, %v318_v37  ;;  %v732_v53 = vpop.f32.mrb[27].mxu0  ;;  %v796_v54 = vpop.f32.mrb[27].mxu1 }
 0x136   : > { %1114 = vst.msk [vmem:[%s1721_s22 + $0x20] sm:$0xf] %vm1105_vm4, %v1366_v31  ;;  %v1383_v40 = vpack.c.bf16 %v970_v34, %v970_v34  ;;  %v835_v52 = vadd.f32 %v794_v48, %v334_v38 }
 0x137   : > { %1130 = vst.msk [vmem:[%s1721_s22 + $0x60] sm:$0xf] %vm1105_vm4, %v1382_v32  ;;  %v884_v45 = vld [vmem:[#allocation2 + $0x50] sm:$0xff]  ;;  %1115 = vst.msk [vmem:[%s1721_s22 + $0x24] sm:$0xf] %vm1105_vm4, %v1367_v39 }
 0x138   : > { %v900_v46 = vld [vmem:[#allocation2 + $0xd0] sm:$0xff]  ;;  %1131 = vst.msk [vmem:[%s1721_s22 + $0x64] sm:$0xf] %vm1105_vm4, %v1383_v40  ;;  %v923_v49 = vadd.f32 %v1707_v2, %v884_v45  ;;  %v885_v55 = vld [vmem:[#allocation2 + $0x58] sm:$0xff] }
 0x139   : > { %v939_v50 = vadd.f32 %v1707_v2, %v900_v46  ;;  %v901_v56 = vld [vmem:[#allocation2 + $0xd8] sm:$0xff]  ;;  %v924_v59 = vadd.f32 %v1707_v2, %v885_v55  ;;  %852 = vst.msk [vmem:[#allocation2 + $0x68] sm:$0xff] %vm272_vm0, %v819_v51  ;;  %868 = vst.msk [vmem:[#allocation2 + $0xe8] sm:$0xff] %vm272_vm0, %v835_v52 }
 0x13a   : > { %v955_v57 = vmax.f32 %v923_v49, 0.0  ;;  %v940_v60 = vadd.f32 %v1707_v2, %v901_v56  ;;  %v735_v4 = vpop.f32.mrb[28].mxu0  ;;  %v799_v5 = vpop.f32.mrb[28].mxu1 }
 0x13b   : > { %v971_v58 = vmax.f32 %v939_v50, 0.0  ;;  %v956_v1 = vmax.f32 %v924_v59, 0.0  ;;  %v820_v10 = vadd.f32 %v735_v4, %v319_v61  ;;  %v836_v11 = vadd.f32 %v799_v5, %v335_v62  ;;  %v737_v12 = vpop.f32.mrb[29].mxu0  ;;  %v801_v13 = vpop.f32.mrb[29].mxu1 }
 0x13c   : > { %v1368_v63 = vpack.c.bf16 %v955_v57, %v955_v57  ;;  %v972_v3 = vmax.f32 %v940_v60, 0.0  ;;  %v886_v14 = vld [vmem:[#allocation2 + $0x60] sm:$0xff]  ;;  %v738_v16 = vpop.f32.mrb[30].mxu0  ;;  %v802_v17 = vpop.f32.mrb[30].mxu1 }
 0x13d   : > { %v1384_v0 = vpack.c.bf16 %v971_v58, %v971_v58  ;;  %v1369_v8 = vpack.c.bf16 %v956_v1, %v956_v1  ;;  %v902_v15 = vld [vmem:[#allocation2 + $0xe0] sm:$0xff]  ;;  %v925_v18 = vadd.f32 %v1707_v2, %v886_v14  ;;  %853 = vst.msk [vmem:[#allocation2 + $0x70] sm:$0xff] %vm272_vm0, %v820_v10  ;;  %869 = vst.msk [vmem:[#allocation2 + $0xf0] sm:$0xff] %vm272_vm0, %v836_v11  ;;  %v740_v22 = vpop.f32.mrb[31].mxu0  ;;  %v804_v23 = vpop.f32.mrb[31].mxu1 }
 0x13e   : > { %1116 = vst.msk [vmem:[%s1721_s22 + $0x28] sm:$0xf] %vm1105_vm4, %v1368_v63  ;;  %v1385_v9 = vpack.c.bf16 %v972_v3, %v972_v3  ;;  %v941_v19 = vadd.f32 %v1707_v2, %v902_v15  ;;  %v821_v20 = vadd.f32 %v738_v16, %v320_v6  ;;  %v837_v21 = vadd.f32 %v802_v17, %v336_v7 }
 0x13f   : > { %1132 = vst.msk [vmem:[%s1721_s22 + $0x68] sm:$0xf] %vm1105_vm4, %v1384_v0  ;;  %1117 = vst.msk [vmem:[%s1721_s22 + $0x2c] sm:$0xf] %vm1105_vm4, %v1369_v8  ;;  %v957_v26 = vmax.f32 %v925_v18, 0.0 }
 0x140   : > { %1133 = vst.msk [vmem:[%s1721_s22 + $0x6c] sm:$0xf] %vm1105_vm4, %v1385_v9  ;;  %v887_v24 = vld [vmem:[#allocation2 + $0x68] sm:$0xff]  ;;  %v973_v27 = vmax.f32 %v941_v19, 0.0 }
 0x141   : > { %v903_v25 = vld [vmem:[#allocation2 + $0xe8] sm:$0xff]  ;;  %v926_v28 = vadd.f32 %v1707_v2, %v887_v24  ;;  %854 = vst.msk [vmem:[#allocation2 + $0x78] sm:$0xff] %vm272_vm0, %v821_v20  ;;  %870 = vst.msk [vmem:[#allocation2 + $0xf8] sm:$0xff] %vm272_vm0, %v837_v21  ;;  %v1370_v30 = vpack.c.bf16 %v957_v26, %v957_v26 }
 0x142   : > { %v942_v29 = vadd.f32 %v1707_v2, %v903_v25  ;;  %v1386_v31 = vpack.c.bf16 %v973_v27, %v973_v27 }
 0x143   : > { %v958_v32 = vmax.f32 %v926_v28, 0.0  ;;  %1118 = vst.msk [vmem:[%s1721_s22 + $0x30] sm:$0xf] %vm1105_vm4, %v1370_v30 }
 0x144   : > { %v974_v33 = vmax.f32 %v942_v29, 0.0  ;;  %1134 = vst.msk [vmem:[%s1721_s22 + $0x70] sm:$0xf] %vm1105_vm4, %v1386_v31  ;;  %v888_v36 = vld [vmem:[#allocation2 + $0x70] sm:$0xff] }
 0x145   : > { %v1371_v34 = vpack.c.bf16 %v958_v32, %v958_v32  ;;  %v904_v37 = vld [vmem:[#allocation2 + $0xf0] sm:$0xff]  ;;  %v927_v38 = vadd.f32 %v1707_v2, %v888_v36 }
 0x146   : > { %v1387_v35 = vpack.c.bf16 %v974_v33, %v974_v33  ;;  %v943_v39 = vadd.f32 %v1707_v2, %v904_v37 }
 0x147   : > { %1119 = vst.msk [vmem:[%s1721_s22 + $0x34] sm:$0xf] %vm1105_vm4, %v1371_v34  ;;  %v959_v42 = vmax.f32 %v927_v38, 0.0 }
 0x148   : > { %1135 = vst.msk [vmem:[%s1721_s22 + $0x74] sm:$0xf] %vm1105_vm4, %v1387_v35  ;;  %v889_v40 = vld [vmem:[#allocation2 + $0x78] sm:$0xff]  ;;  %v975_v43 = vmax.f32 %v943_v39, 0.0 }
 0x149   : > { %v905_v41 = vld [vmem:[#allocation2 + $0xf8] sm:$0xff]  ;;  %v928_v44 = vadd.f32 %v1707_v2, %v889_v40  ;;  %v1372_v46 = vpack.c.bf16 %v959_v42, %v959_v42 }
 0x14a   : > { %v944_v45 = vadd.f32 %v1707_v2, %v905_v41  ;;  %v1388_v47 = vpack.c.bf16 %v975_v43, %v975_v43 }
 0x14b   : > { %v960_v48 = vmax.f32 %v928_v44, 0.0  ;;  %1120 = vst.msk [vmem:[%s1721_s22 + $0x38] sm:$0xf] %vm1105_vm4, %v1372_v46 }
 0x14c   : > { %v976_v49 = vmax.f32 %v944_v45, 0.0  ;;  %1136 = vst.msk [vmem:[%s1721_s22 + $0x78] sm:$0xf] %vm1105_vm4, %v1388_v47 }
 0x14d   : > { %v1373_v50 = vpack.c.bf16 %v960_v48, %v960_v48 }
 0x14e   : > { %v1389_v51 = vpack.c.bf16 %v976_v49, %v976_v49 }
 0x14f   : > { %1121 = vst.msk [vmem:[%s1721_s22 + $0x3c] sm:$0xf] %vm1105_vm4, %v1373_v50 }
 0x150   : > { %1137 = vst.msk [vmem:[%s1721_s22 + $0x7c] sm:$0xf] %vm1105_vm4, %v1389_v51 }
 0x151 PF: > { %s13_s14 = sadd.s32 1, %s1517_s14   ;;  %s1852_s12 = smov %s1513_s13 }
 0x152   : > { %p10_p5 = scmp.ge.s32.totalorder %s13_s14, 4   ;;  %s1853_s13 = smov %s1855_s15 }
 0x154   :  { %12 = sbr.rel (!%p10_p5) target bundleno = 2 (0x2), region = 76 }

</bundles_post_ra>
